<compile_context>
chip_gen: v6e
topology: v6e:2x2x1
jax: 0.10.0
libtpu: 0.0.40
codegen_flags: <defaults>
</compile_context>

<pallas_src>
import numpy as np
import jax
import jax.numpy as jnp
from jax.experimental import pallas as pl
from jax.experimental.pallas import tpu as pltpu


def _pairwise_interaction_kernel(x_ref, wW_ref, bW_ref, wh_ref, wo_ref, bo_ref, out_ref):
    """x_ref: (N, D, bt) with the batch tile on the 128-lane axis; out_ref: (1, bt)."""
    n_feat = x_ref.shape[0]
    f32 = jnp.float32

    def row(n):  # lazily load one feature row from VMEM: (D, bt)
        return x_ref[n].astype(f32)

    # ---- attn_pair_wise_x: s[d,b] = sum_{i<j} x[i,d,b]*x[j,d,b]  (suffix-sum grouping) ----
    suffix = row(n_feat - 1)                 # running sum_{j>i} x_j, built back to front
    xi = row(n_feat - 2)
    s = xi * suffix
    suffix = suffix + xi
    for i in range(n_feat - 3, -1, -1):
        xi = row(i)
        s = s + xi * suffix
        suffix = suffix + xi                 # (D, bt)

    # ---- attn_temp = relu(W s + bW)   -> (A, bt), MXU ----
    t = jnp.dot(wW_ref[...], s, preferred_element_type=f32) + bW_ref[...]
    t = jnp.maximum(t, 0.0)

    # ---- attn_weight = softmax over pairs (sublane axis)  -> (P, bt) ----
    logits = jnp.dot(wh_ref[...], t, preferred_element_type=f32)
    m = jnp.max(logits, axis=0, keepdims=True)
    e = jnp.exp(logits - m)
    w = e * pl.reciprocal(jnp.sum(e, axis=0, keepdims=True), approx=True)
    # TODO(synk): dropout on the attention weights is identity (eval mode).

    # ---- attention-weighted pooling ----
    # out_x[d,b] = sum_p w[p,b]*x[i_p,d,b]*x[j_p,d,b] = sum_i x_i * (sum_{j>i} w[pair(i,j)]*x_j)
    # pair index p follows torch.triu_indices(N, N, offset=1) row-major order.
    acc_even = None
    acc_odd = None
    p = 0
    for i in range(n_feat - 1):
        inner = w[p:p + 1] * row(i + 1)      # (1, bt) * (D, bt): cheap sublane broadcast
        p += 1
        for j in range(i + 2, n_feat):
            inner = inner + w[p:p + 1] * row(j)
            p += 1
        term = row(i) * inner
        if i % 2 == 0:
            acc_even = term if acc_even is None else acc_even + term
        else:
            acc_odd = term if acc_odd is None else acc_odd + term
    out_x = acc_even if acc_odd is None else acc_even + acc_odd      # (D, bt)

    # ---- output_layer: y[b] = sum_d wo[d]*out_x[d,b] + bo   -> (1, bt), lane-dense ----
    y = jnp.dot(wo_ref[...], out_x, preferred_element_type=f32) + bo_ref[...]
    out_ref[...] = y.astype(out_ref.dtype)


def _ceil_to(v: int, m: int) -> int:
    return -(-v // m) * m


def pairwise_interaction_layer(x, wW, bW, wh, wo, bo, *, block_b=512):
    """AFM pairwise-interaction layer forward.

    x : (B, N, D) activations (f32 or bf16)
    wW: (A, D), bW: (A,)/(A,1)   -- self.W            (nn.Linear(embed_dim, attn_factor_size))
    wh: (P, A)                   -- self.h            (nn.Linear(attn_factor_size, P, bias=False))
    wo: (1, D), bo: (1,)/(1,1)   -- self.output_layer (nn.Linear(embed_dim, 1))
    Returns (B, 1) logits.
    """
    B, N, D = x.shape
    A = wW.shape[0]
    P = N * (N - 1) // 2
    assert wW.shape == (A, D) and wh.shape == (P, A) and wo.shape == (1, D)
    bW = jnp.asarray(bW, jnp.float32).reshape(A, 1)
    bo = jnp.asarray(bo, jnp.float32).reshape(1, 1)

    # ---- batch tile bt: lane axis, multiple of 128 ----
    bt = max(128, 128 * (block_b // 128))
    bt = min(bt, _ceil_to(B, 128))                       # never bigger than the padded batch
    if B >= 256:
        # keep >= 2 grid steps so the "parallel" batch axis can shard across v7x's 2 TensorCores
        bt = min(bt, _ceil_to(-(-B // 2), 128))
    # Double-buffered x tile must sit comfortably under the smallest default scoped-VMEM budget
    # (v5e: 16 MiB).  For bigger tiles raise pltpu.CompilerParams(vmem_limit_bytes=...).
    row_bytes = N * D * x.dtype.itemsize
    bt_vmem = max(128, ((12 * 1024 * 1024) // (2 * row_bytes)) // 128 * 128)
    bt = min(bt, bt_vmem)

    Bp = _ceil_to(B, bt)
    if Bp != B:
        x = jnp.pad(x, ((0, Bp - B), (0, 0), (0, 0)))
    # Batch-in-lanes layout for the kernel: (N, D, Bp).  Wrapper-side transpose = layout plumbing.
    x_t = jnp.transpose(x, (1, 2, 0))

    out = pl.pallas_call(
        _pairwise_interaction_kernel,
        out_shape=jax.ShapeDtypeStruct((1, Bp), jnp.float32),
        grid=(Bp // bt,),
        in_specs=[
            pl.BlockSpec((N, D, bt), lambda i: (0, 0, i)),   # x tile, auto double-buffered DMA
            pl.BlockSpec((A, D), lambda i: (0, 0)),          # weights: constant block index ->
            pl.BlockSpec((A, 1), lambda i: (0, 0)),          #   stay VMEM-resident across steps
            pl.BlockSpec((P, A), lambda i: (0, 0)),
            pl.BlockSpec((1, D), lambda i: (0, 0)),
            pl.BlockSpec((1, 1), lambda i: (0, 0)),
        ],
        out_specs=pl.BlockSpec((1, bt), lambda i: (0, i)),   # lane-dense output row
        compiler_params=pltpu.CompilerParams(
            dimension_semantics=("parallel",)),
    )(x_t, wW, bW, wh, wo, bo)
    return out.reshape(Bp, 1)[:B]


def _reference(x, wW, bW, wh, wo, bo):
    N = x.shape[1]
    idx_i, idx_j = np.triu_indices(N, k=1)
    pair = x[:, idx_i, :] * x[:, idx_j, :]          # (B, P, D)
    s = jnp.sum(pair, axis=1)                       # (B, D)
    t = jax.nn.relu(s @ wW.T + bW.reshape(1, -1))   # (B, A)
    w = jax.nn.softmax(t @ wh.T, axis=-1)           # (B, P)
    out = jnp.sum(w[:, :, None] * pair, axis=1)     # (B, D)
    return out @ wo.T + bo.reshape(1, 1)            # (B, 1)


if __name__ == "__main__":
    # Small shapes consistent with the module's forward.
    B = 16        # batch
    N = 8         # feature_nums
    D = 32        # embed_dim
    A = 16        # attn_factor_size
    P = N * (N - 1) // 2   # 28 pairs

    key = jax.random.PRNGKey(0)
    kx, kW, kbW, kh, ko, kbo = jax.random.split(key, 6)

    x = jax.random.normal(kx, (B, N, D), dtype=jnp.float32)
    # Parameters in nn.Linear (out_features, in_features) layout, deterministic init.
    wW = jax.random.normal(kW, (A, D), dtype=jnp.float32) * (1.0 / np.sqrt(D))
    bW = jax.random.normal(kbW, (A,), dtype=jnp.float32) * 0.01
    wh = jax.random.normal(kh, (P, A), dtype=jnp.float32) * (1.0 / np.sqrt(A))
    wo = jax.random.normal(ko, (1, D), dtype=jnp.float32) * (1.0 / np.sqrt(D))
    bo = jax.random.normal(kbo, (1, 1), dtype=jnp.float32) * 0.01

    out = jax.block_until_ready(pairwise_interaction_layer(x, wW, bW, wh, wo, bo))
    ref = jax.block_until_ready(_reference(x, wW, bW, wh, wo, bo))

    assert out.shape == (B, 1)
    assert np.allclose(np.asarray(out), np.asarray(ref), rtol=1e-2, atol=1e-2), (
        float(np.max(np.abs(np.asarray(out) - np.asarray(ref)))))
    print("KERNEL_OK")
</pallas_src>

<mosaic_0001>
module attributes {stable_mosaic.version = 11 : i64} {
  func.func @_pairwise_interaction_kernel(%arg0: i32, %arg1: memref<8x32x128xf32, #tpu.memory_space<vmem>>, %arg2: memref<16x32xf32, #tpu.memory_space<vmem>>, %arg3: memref<16x1xf32, #tpu.memory_space<vmem>>, %arg4: memref<28x16xf32, #tpu.memory_space<vmem>>, %arg5: memref<1x32xf32, #tpu.memory_space<vmem>>, %arg6: memref<1x1xf32, #tpu.memory_space<vmem>>, %arg7: memref<1x128xf32, #tpu.memory_space<vmem>>) attributes {dimension_semantics = [#tpu.dimension_semantics<parallel>], iteration_bounds = array<i64: 1>, scalar_prefetch = 0 : i64, scratch_operands = 0 : i64, tpu.core_type = #tpu.core_type<tc>, window_params = [{transform_indices = @transform_0, window_bounds = array<i64: 8, 32, 128>}, {pipeline_mode = #tpu.pipeline_mode<synchronous>, transform_indices = @transform_1, window_bounds = array<i64: 16, 32>}, {pipeline_mode = #tpu.pipeline_mode<synchronous>, transform_indices = @transform_2, window_bounds = array<i64: 16, 1>}, {pipeline_mode = #tpu.pipeline_mode<synchronous>, transform_indices = @transform_3, window_bounds = array<i64: 28, 16>}, {pipeline_mode = #tpu.pipeline_mode<synchronous>, transform_indices = @transform_4, window_bounds = array<i64: 1, 32>}, {pipeline_mode = #tpu.pipeline_mode<synchronous>, transform_indices = @transform_5, window_bounds = array<i64: 1, 1>}, {transform_indices = @transform_6, window_bounds = array<i64: 1, 128>}]} {
    %c7 = arith.constant 7 : index
    %c0 = arith.constant 0 : index
    %c0_0 = arith.constant 0 : index
    %0 = vector.load %arg1[%c7, %c0, %c0_0] : memref<8x32x128xf32, #tpu.memory_space<vmem>>, vector<1x32x128xf32>
    %1 = vector.shape_cast %0 : vector<1x32x128xf32> to vector<32x128xf32>
    %c6 = arith.constant 6 : index
    %c0_1 = arith.constant 0 : index
    %c0_2 = arith.constant 0 : index
    %2 = vector.load %arg1[%c6, %c0_1, %c0_2] : memref<8x32x128xf32, #tpu.memory_space<vmem>>, vector<1x32x128xf32>
    %3 = vector.shape_cast %2 : vector<1x32x128xf32> to vector<32x128xf32>
    %4 = arith.mulf %3, %1 : vector<32x128xf32>
    %5 = arith.addf %1, %3 : vector<32x128xf32>
    %c5 = arith.constant 5 : index
    %c0_3 = arith.constant 0 : index
    %c0_4 = arith.constant 0 : index
    %6 = vector.load %arg1[%c5, %c0_3, %c0_4] : memref<8x32x128xf32, #tpu.memory_space<vmem>>, vector<1x32x128xf32>
    %7 = vector.shape_cast %6 : vector<1x32x128xf32> to vector<32x128xf32>
    %8 = arith.mulf %7, %5 : vector<32x128xf32>
    %9 = arith.addf %4, %8 : vector<32x128xf32>
    %10 = arith.addf %5, %7 : vector<32x128xf32>
    %c4 = arith.constant 4 : index
    %c0_5 = arith.constant 0 : index
    %c0_6 = arith.constant 0 : index
    %11 = vector.load %arg1[%c4, %c0_5, %c0_6] : memref<8x32x128xf32, #tpu.memory_space<vmem>>, vector<1x32x128xf32>
    %12 = vector.shape_cast %11 : vector<1x32x128xf32> to vector<32x128xf32>
    %13 = arith.mulf %12, %10 : vector<32x128xf32>
    %14 = arith.addf %9, %13 : vector<32x128xf32>
    %15 = arith.addf %10, %12 : vector<32x128xf32>
    %c3 = arith.constant 3 : index
    %c0_7 = arith.constant 0 : index
    %c0_8 = arith.constant 0 : index
    %16 = vector.load %arg1[%c3, %c0_7, %c0_8] : memref<8x32x128xf32, #tpu.memory_space<vmem>>, vector<1x32x128xf32>
    %17 = vector.shape_cast %16 : vector<1x32x128xf32> to vector<32x128xf32>
    %18 = arith.mulf %17, %15 : vector<32x128xf32>
    %19 = arith.addf %14, %18 : vector<32x128xf32>
    %20 = arith.addf %15, %17 : vector<32x128xf32>
    %c2 = arith.constant 2 : index
    %c0_9 = arith.constant 0 : index
    %c0_10 = arith.constant 0 : index
    %21 = vector.load %arg1[%c2, %c0_9, %c0_10] : memref<8x32x128xf32, #tpu.memory_space<vmem>>, vector<1x32x128xf32>
    %22 = vector.shape_cast %21 : vector<1x32x128xf32> to vector<32x128xf32>
    %23 = arith.mulf %22, %20 : vector<32x128xf32>
    %24 = arith.addf %19, %23 : vector<32x128xf32>
    %25 = arith.addf %20, %22 : vector<32x128xf32>
    %c1 = arith.constant 1 : index
    %c0_11 = arith.constant 0 : index
    %c0_12 = arith.constant 0 : index
    %26 = vector.load %arg1[%c1, %c0_11, %c0_12] : memref<8x32x128xf32, #tpu.memory_space<vmem>>, vector<1x32x128xf32>
    %27 = vector.shape_cast %26 : vector<1x32x128xf32> to vector<32x128xf32>
    %28 = arith.mulf %27, %25 : vector<32x128xf32>
    %29 = arith.addf %24, %28 : vector<32x128xf32>
    %30 = arith.addf %25, %27 : vector<32x128xf32>
    %c0_13 = arith.constant 0 : index
    %c0_14 = arith.constant 0 : index
    %c0_15 = arith.constant 0 : index
    %31 = vector.load %arg1[%c0_13, %c0_14, %c0_15] : memref<8x32x128xf32, #tpu.memory_space<vmem>>, vector<1x32x128xf32>
    %32 = vector.shape_cast %31 : vector<1x32x128xf32> to vector<32x128xf32>
    %33 = arith.mulf %32, %30 : vector<32x128xf32>
    %34 = arith.addf %29, %33 : vector<32x128xf32>
    %c0_16 = arith.constant 0 : index
    %c0_17 = arith.constant 0 : index
    %35 = vector.load %arg2[%c0_16, %c0_17] : memref<16x32xf32, #tpu.memory_space<vmem>>, vector<16x32xf32>
    %cst = arith.constant dense<0.000000e+00> : vector<16x128xf32>
    %36 = tpu.matmul %35, %34, %cst {dimension_numbers = #tpu.dot_dimension_numbers<[1], [0], [0], [1], [0, 0, 1, 1], [], []>} : vector<16x32xf32>, vector<32x128xf32>, vector<16x128xf32> -> vector<16x128xf32>
    %c0_18 = arith.constant 0 : index
    %c0_19 = arith.constant 0 : index
    %37 = vector.load %arg3[%c0_18, %c0_19] : memref<16x1xf32, #tpu.memory_space<vmem>>, vector<16x1xf32>
    %38 = vector.broadcast %37 : vector<16x1xf32> to vector<16x128xf32>
    %39 = arith.addf %36, %38 : vector<16x128xf32>
    %cst_20 = arith.constant 0.000000e+00 : f32
    %40 = vector.broadcast %cst_20 : f32 to vector<16x128xf32>
    %41 = arith.maximumf %39, %40 : vector<16x128xf32>
    %c0_21 = arith.constant 0 : index
    %c0_22 = arith.constant 0 : index
    %42 = vector.load %arg4[%c0_21, %c0_22] : memref<28x16xf32, #tpu.memory_space<vmem>>, vector<28x16xf32>
    %cst_23 = arith.constant dense<0.000000e+00> : vector<28x128xf32>
    %43 = tpu.matmul %42, %41, %cst_23 {dimension_numbers = #tpu.dot_dimension_numbers<[1], [0], [0], [1], [0, 0, 1, 1], [], []>} : vector<28x16xf32>, vector<16x128xf32>, vector<28x128xf32> -> vector<28x128xf32>
    %cst_24 = arith.constant dense<0xFF800000> : vector<128xf32>
    %44 = vector.multi_reduction <maximumf>, %43, %cst_24 [0] : vector<28x128xf32> to vector<128xf32>
    %45 = vector.shape_cast %44 : vector<128xf32> to vector<1x128xf32>
    %46 = vector.broadcast %45 : vector<1x128xf32> to vector<28x128xf32>
    %47 = arith.subf %43, %46 : vector<28x128xf32>
    %48 = math.exp %47 : vector<28x128xf32>
    %cst_25 = arith.constant dense<0.000000e+00> : vector<128xf32>
    %49 = vector.multi_reduction <add>, %48, %cst_25 [0] : vector<28x128xf32> to vector<128xf32>
    %50 = vector.shape_cast %49 : vector<128xf32> to vector<1x128xf32>
    %51 = tpu.reciprocal %50 {approx = true} : vector<1x128xf32> -> vector<1x128xf32>
    %52 = vector.broadcast %51 : vector<1x128xf32> to vector<28x128xf32>
    %53 = arith.mulf %48, %52 : vector<28x128xf32>
    %54 = vector.extract_strided_slice %53 {offsets = [0, 0], sizes = [1, 128], strides = [1, 1]} : vector<28x128xf32> to vector<1x128xf32>
    %c1_26 = arith.constant 1 : index
    %c0_27 = arith.constant 0 : index
    %c0_28 = arith.constant 0 : index
    %55 = vector.load %arg1[%c1_26, %c0_27, %c0_28] : memref<8x32x128xf32, #tpu.memory_space<vmem>>, vector<1x32x128xf32>
    %56 = vector.shape_cast %55 : vector<1x32x128xf32> to vector<32x128xf32>
    %57 = vector.broadcast %54 : vector<1x128xf32> to vector<32x128xf32>
    %58 = arith.mulf %57, %56 : vector<32x128xf32>
    %59 = vector.extract_strided_slice %53 {offsets = [1, 0], sizes = [1, 128], strides = [1, 1]} : vector<28x128xf32> to vector<1x128xf32>
    %c2_29 = arith.constant 2 : index
    %c0_30 = arith.constant 0 : index
    %c0_31 = arith.constant 0 : index
    %60 = vector.load %arg1[%c2_29, %c0_30, %c0_31] : memref<8x32x128xf32, #tpu.memory_space<vmem>>, vector<1x32x128xf32>
    %61 = vector.shape_cast %60 : vector<1x32x128xf32> to vector<32x128xf32>
    %62 = vector.broadcast %59 : vector<1x128xf32> to vector<32x128xf32>
    %63 = arith.mulf %62, %61 : vector<32x128xf32>
    %64 = arith.addf %58, %63 : vector<32x128xf32>
    %65 = vector.extract_strided_slice %53 {offsets = [2, 0], sizes = [1, 128], strides = [1, 1]} : vector<28x128xf32> to vector<1x128xf32>
    %c3_32 = arith.constant 3 : index
    %c0_33 = arith.constant 0 : index
    %c0_34 = arith.constant 0 : index
    %66 = vector.load %arg1[%c3_32, %c0_33, %c0_34] : memref<8x32x128xf32, #tpu.memory_space<vmem>>, vector<1x32x128xf32>
    %67 = vector.shape_cast %66 : vector<1x32x128xf32> to vector<32x128xf32>
    %68 = vector.broadcast %65 : vector<1x128xf32> to vector<32x128xf32>
    %69 = arith.mulf %68, %67 : vector<32x128xf32>
    %70 = arith.addf %64, %69 : vector<32x128xf32>
    %71 = vector.extract_strided_slice %53 {offsets = [3, 0], sizes = [1, 128], strides = [1, 1]} : vector<28x128xf32> to vector<1x128xf32>
    %c4_35 = arith.constant 4 : index
    %c0_36 = arith.constant 0 : index
    %c0_37 = arith.constant 0 : index
    %72 = vector.load %arg1[%c4_35, %c0_36, %c0_37] : memref<8x32x128xf32, #tpu.memory_space<vmem>>, vector<1x32x128xf32>
    %73 = vector.shape_cast %72 : vector<1x32x128xf32> to vector<32x128xf32>
    %74 = vector.broadcast %71 : vector<1x128xf32> to vector<32x128xf32>
    %75 = arith.mulf %74, %73 : vector<32x128xf32>
    %76 = arith.addf %70, %75 : vector<32x128xf32>
    %77 = vector.extract_strided_slice %53 {offsets = [4, 0], sizes = [1, 128], strides = [1, 1]} : vector<28x128xf32> to vector<1x128xf32>
    %c5_38 = arith.constant 5 : index
    %c0_39 = arith.constant 0 : index
    %c0_40 = arith.constant 0 : index
    %78 = vector.load %arg1[%c5_38, %c0_39, %c0_40] : memref<8x32x128xf32, #tpu.memory_space<vmem>>, vector<1x32x128xf32>
    %79 = vector.shape_cast %78 : vector<1x32x128xf32> to vector<32x128xf32>
    %80 = vector.broadcast %77 : vector<1x128xf32> to vector<32x128xf32>
    %81 = arith.mulf %80, %79 : vector<32x128xf32>
    %82 = arith.addf %76, %81 : vector<32x128xf32>
    %83 = vector.extract_strided_slice %53 {offsets = [5, 0], sizes = [1, 128], strides = [1, 1]} : vector<28x128xf32> to vector<1x128xf32>
    %c6_41 = arith.constant 6 : index
    %c0_42 = arith.constant 0 : index
    %c0_43 = arith.constant 0 : index
    %84 = vector.load %arg1[%c6_41, %c0_42, %c0_43] : memref<8x32x128xf32, #tpu.memory_space<vmem>>, vector<1x32x128xf32>
    %85 = vector.shape_cast %84 : vector<1x32x128xf32> to vector<32x128xf32>
    %86 = vector.broadcast %83 : vector<1x128xf32> to vector<32x128xf32>
    %87 = arith.mulf %86, %85 : vector<32x128xf32>
    %88 = arith.addf %82, %87 : vector<32x128xf32>
    %89 = vector.extract_strided_slice %53 {offsets = [6, 0], sizes = [1, 128], strides = [1, 1]} : vector<28x128xf32> to vector<1x128xf32>
    %c7_44 = arith.constant 7 : index
    %c0_45 = arith.constant 0 : index
    %c0_46 = arith.constant 0 : index
    %90 = vector.load %arg1[%c7_44, %c0_45, %c0_46] : memref<8x32x128xf32, #tpu.memory_space<vmem>>, vector<1x32x128xf32>
    %91 = vector.shape_cast %90 : vector<1x32x128xf32> to vector<32x128xf32>
    %92 = vector.broadcast %89 : vector<1x128xf32> to vector<32x128xf32>
    %93 = arith.mulf %92, %91 : vector<32x128xf32>
    %94 = arith.addf %88, %93 : vector<32x128xf32>
    %c0_47 = arith.constant 0 : index
    %c0_48 = arith.constant 0 : index
    %c0_49 = arith.constant 0 : index
    %95 = vector.load %arg1[%c0_47, %c0_48, %c0_49] : memref<8x32x128xf32, #tpu.memory_space<vmem>>, vector<1x32x128xf32>
    %96 = vector.shape_cast %95 : vector<1x32x128xf32> to vector<32x128xf32>
    %97 = arith.mulf %96, %94 : vector<32x128xf32>
    %98 = vector.extract_strided_slice %53 {offsets = [7, 0], sizes = [1, 128], strides = [1, 1]} : vector<28x128xf32> to vector<1x128xf32>
    %c2_50 = arith.constant 2 : index
    %c0_51 = arith.constant 0 : index
    %c0_52 = arith.constant 0 : index
    %99 = vector.load %arg1[%c2_50, %c0_51, %c0_52] : memref<8x32x128xf32, #tpu.memory_space<vmem>>, vector<1x32x128xf32>
    %100 = vector.shape_cast %99 : vector<1x32x128xf32> to vector<32x128xf32>
    %101 = vector.broadcast %98 : vector<1x128xf32> to vector<32x128xf32>
    %102 = arith.mulf %101, %100 : vector<32x128xf32>
    %103 = vector.extract_strided_slice %53 {offsets = [8, 0], sizes = [1, 128], strides = [1, 1]} : vector<28x128xf32> to vector<1x128xf32>
    %c3_53 = arith.constant 3 : index
    %c0_54 = arith.constant 0 : index
    %c0_55 = arith.constant 0 : index
    %104 = vector.load %arg1[%c3_53, %c0_54, %c0_55] : memref<8x32x128xf32, #tpu.memory_space<vmem>>, vector<1x32x128xf32>
    %105 = vector.shape_cast %104 : vector<1x32x128xf32> to vector<32x128xf32>
    %106 = vector.broadcast %103 : vector<1x128xf32> to vector<32x128xf32>
    %107 = arith.mulf %106, %105 : vector<32x128xf32>
    %108 = arith.addf %102, %107 : vector<32x128xf32>
    %109 = vector.extract_strided_slice %53 {offsets = [9, 0], sizes = [1, 128], strides = [1, 1]} : vector<28x128xf32> to vector<1x128xf32>
    %c4_56 = arith.constant 4 : index
    %c0_57 = arith.constant 0 : index
    %c0_58 = arith.constant 0 : index
    %110 = vector.load %arg1[%c4_56, %c0_57, %c0_58] : memref<8x32x128xf32, #tpu.memory_space<vmem>>, vector<1x32x128xf32>
    %111 = vector.shape_cast %110 : vector<1x32x128xf32> to vector<32x128xf32>
    %112 = vector.broadcast %109 : vector<1x128xf32> to vector<32x128xf32>
    %113 = arith.mulf %112, %111 : vector<32x128xf32>
    %114 = arith.addf %108, %113 : vector<32x128xf32>
    %115 = vector.extract_strided_slice %53 {offsets = [10, 0], sizes = [1, 128], strides = [1, 1]} : vector<28x128xf32> to vector<1x128xf32>
    %c5_59 = arith.constant 5 : index
    %c0_60 = arith.constant 0 : index
    %c0_61 = arith.constant 0 : index
    %116 = vector.load %arg1[%c5_59, %c0_60, %c0_61] : memref<8x32x128xf32, #tpu.memory_space<vmem>>, vector<1x32x128xf32>
    %117 = vector.shape_cast %116 : vector<1x32x128xf32> to vector<32x128xf32>
    %118 = vector.broadcast %115 : vector<1x128xf32> to vector<32x128xf32>
    %119 = arith.mulf %118, %117 : vector<32x128xf32>
    %120 = arith.addf %114, %119 : vector<32x128xf32>
    %121 = vector.extract_strided_slice %53 {offsets = [11, 0], sizes = [1, 128], strides = [1, 1]} : vector<28x128xf32> to vector<1x128xf32>
    %c6_62 = arith.constant 6 : index
    %c0_63 = arith.constant 0 : index
    %c0_64 = arith.constant 0 : index
    %122 = vector.load %arg1[%c6_62, %c0_63, %c0_64] : memref<8x32x128xf32, #tpu.memory_space<vmem>>, vector<1x32x128xf32>
    %123 = vector.shape_cast %122 : vector<1x32x128xf32> to vector<32x128xf32>
    %124 = vector.broadcast %121 : vector<1x128xf32> to vector<32x128xf32>
    %125 = arith.mulf %124, %123 : vector<32x128xf32>
    %126 = arith.addf %120, %125 : vector<32x128xf32>
    %127 = vector.extract_strided_slice %53 {offsets = [12, 0], sizes = [1, 128], strides = [1, 1]} : vector<28x128xf32> to vector<1x128xf32>
    %c7_65 = arith.constant 7 : index
    %c0_66 = arith.constant 0 : index
    %c0_67 = arith.constant 0 : index
    %128 = vector.load %arg1[%c7_65, %c0_66, %c0_67] : memref<8x32x128xf32, #tpu.memory_space<vmem>>, vector<1x32x128xf32>
    %129 = vector.shape_cast %128 : vector<1x32x128xf32> to vector<32x128xf32>
    %130 = vector.broadcast %127 : vector<1x128xf32> to vector<32x128xf32>
    %131 = arith.mulf %130, %129 : vector<32x128xf32>
    %132 = arith.addf %126, %131 : vector<32x128xf32>
    %c1_68 = arith.constant 1 : index
    %c0_69 = arith.constant 0 : index
    %c0_70 = arith.constant 0 : index
    %133 = vector.load %arg1[%c1_68, %c0_69, %c0_70] : memref<8x32x128xf32, #tpu.memory_space<vmem>>, vector<1x32x128xf32>
    %134 = vector.shape_cast %133 : vector<1x32x128xf32> to vector<32x128xf32>
    %135 = arith.mulf %134, %132 : vector<32x128xf32>
    %136 = vector.extract_strided_slice %53 {offsets = [13, 0], sizes = [1, 128], strides = [1, 1]} : vector<28x128xf32> to vector<1x128xf32>
    %c3_71 = arith.constant 3 : index
    %c0_72 = arith.constant 0 : index
    %c0_73 = arith.constant 0 : index
    %137 = vector.load %arg1[%c3_71, %c0_72, %c0_73] : memref<8x32x128xf32, #tpu.memory_space<vmem>>, vector<1x32x128xf32>
    %138 = vector.shape_cast %137 : vector<1x32x128xf32> to vector<32x128xf32>
    %139 = vector.broadcast %136 : vector<1x128xf32> to vector<32x128xf32>
    %140 = arith.mulf %139, %138 : vector<32x128xf32>
    %141 = vector.extract_strided_slice %53 {offsets = [14, 0], sizes = [1, 128], strides = [1, 1]} : vector<28x128xf32> to vector<1x128xf32>
    %c4_74 = arith.constant 4 : index
    %c0_75 = arith.constant 0 : index
    %c0_76 = arith.constant 0 : index
    %142 = vector.load %arg1[%c4_74, %c0_75, %c0_76] : memref<8x32x128xf32, #tpu.memory_space<vmem>>, vector<1x32x128xf32>
    %143 = vector.shape_cast %142 : vector<1x32x128xf32> to vector<32x128xf32>
    %144 = vector.broadcast %141 : vector<1x128xf32> to vector<32x128xf32>
    %145 = arith.mulf %144, %143 : vector<32x128xf32>
    %146 = arith.addf %140, %145 : vector<32x128xf32>
    %147 = vector.extract_strided_slice %53 {offsets = [15, 0], sizes = [1, 128], strides = [1, 1]} : vector<28x128xf32> to vector<1x128xf32>
    %c5_77 = arith.constant 5 : index
    %c0_78 = arith.constant 0 : index
    %c0_79 = arith.constant 0 : index
    %148 = vector.load %arg1[%c5_77, %c0_78, %c0_79] : memref<8x32x128xf32, #tpu.memory_space<vmem>>, vector<1x32x128xf32>
    %149 = vector.shape_cast %148 : vector<1x32x128xf32> to vector<32x128xf32>
    %150 = vector.broadcast %147 : vector<1x128xf32> to vector<32x128xf32>
    %151 = arith.mulf %150, %149 : vector<32x128xf32>
    %152 = arith.addf %146, %151 : vector<32x128xf32>
    %153 = vector.extract_strided_slice %53 {offsets = [16, 0], sizes = [1, 128], strides = [1, 1]} : vector<28x128xf32> to vector<1x128xf32>
    %c6_80 = arith.constant 6 : index
    %c0_81 = arith.constant 0 : index
    %c0_82 = arith.constant 0 : index
    %154 = vector.load %arg1[%c6_80, %c0_81, %c0_82] : memref<8x32x128xf32, #tpu.memory_space<vmem>>, vector<1x32x128xf32>
    %155 = vector.shape_cast %154 : vector<1x32x128xf32> to vector<32x128xf32>
    %156 = vector.broadcast %153 : vector<1x128xf32> to vector<32x128xf32>
    %157 = arith.mulf %156, %155 : vector<32x128xf32>
    %158 = arith.addf %152, %157 : vector<32x128xf32>
    %159 = vector.extract_strided_slice %53 {offsets = [17, 0], sizes = [1, 128], strides = [1, 1]} : vector<28x128xf32> to vector<1x128xf32>
    %c7_83 = arith.constant 7 : index
    %c0_84 = arith.constant 0 : index
    %c0_85 = arith.constant 0 : index
    %160 = vector.load %arg1[%c7_83, %c0_84, %c0_85] : memref<8x32x128xf32, #tpu.memory_space<vmem>>, vector<1x32x128xf32>
    %161 = vector.shape_cast %160 : vector<1x32x128xf32> to vector<32x128xf32>
    %162 = vector.broadcast %159 : vector<1x128xf32> to vector<32x128xf32>
    %163 = arith.mulf %162, %161 : vector<32x128xf32>
    %164 = arith.addf %158, %163 : vector<32x128xf32>
    %c2_86 = arith.constant 2 : index
    %c0_87 = arith.constant 0 : index
    %c0_88 = arith.constant 0 : index
    %165 = vector.load %arg1[%c2_86, %c0_87, %c0_88] : memref<8x32x128xf32, #tpu.memory_space<vmem>>, vector<1x32x128xf32>
    %166 = vector.shape_cast %165 : vector<1x32x128xf32> to vector<32x128xf32>
    %167 = arith.mulf %166, %164 : vector<32x128xf32>
    %168 = arith.addf %97, %167 : vector<32x128xf32>
    %169 = vector.extract_strided_slice %53 {offsets = [18, 0], sizes = [1, 128], strides = [1, 1]} : vector<28x128xf32> to vector<1x128xf32>
    %c4_89 = arith.constant 4 : index
    %c0_90 = arith.constant 0 : index
    %c0_91 = arith.constant 0 : index
    %170 = vector.load %arg1[%c4_89, %c0_90, %c0_91] : memref<8x32x128xf32, #tpu.memory_space<vmem>>, vector<1x32x128xf32>
    %171 = vector.shape_cast %170 : vector<1x32x128xf32> to vector<32x128xf32>
    %172 = vector.broadcast %169 : vector<1x128xf32> to vector<32x128xf32>
    %173 = arith.mulf %172, %171 : vector<32x128xf32>
    %174 = vector.extract_strided_slice %53 {offsets = [19, 0], sizes = [1, 128], strides = [1, 1]} : vector<28x128xf32> to vector<1x128xf32>
    %c5_92 = arith.constant 5 : index
    %c0_93 = arith.constant 0 : index
    %c0_94 = arith.constant 0 : index
    %175 = vector.load %arg1[%c5_92, %c0_93, %c0_94] : memref<8x32x128xf32, #tpu.memory_space<vmem>>, vector<1x32x128xf32>
    %176 = vector.shape_cast %175 : vector<1x32x128xf32> to vector<32x128xf32>
    %177 = vector.broadcast %174 : vector<1x128xf32> to vector<32x128xf32>
    %178 = arith.mulf %177, %176 : vector<32x128xf32>
    %179 = arith.addf %173, %178 : vector<32x128xf32>
    %180 = vector.extract_strided_slice %53 {offsets = [20, 0], sizes = [1, 128], strides = [1, 1]} : vector<28x128xf32> to vector<1x128xf32>
    %c6_95 = arith.constant 6 : index
    %c0_96 = arith.constant 0 : index
    %c0_97 = arith.constant 0 : index
    %181 = vector.load %arg1[%c6_95, %c0_96, %c0_97] : memref<8x32x128xf32, #tpu.memory_space<vmem>>, vector<1x32x128xf32>
    %182 = vector.shape_cast %181 : vector<1x32x128xf32> to vector<32x128xf32>
    %183 = vector.broadcast %180 : vector<1x128xf32> to vector<32x128xf32>
    %184 = arith.mulf %183, %182 : vector<32x128xf32>
    %185 = arith.addf %179, %184 : vector<32x128xf32>
    %186 = vector.extract_strided_slice %53 {offsets = [21, 0], sizes = [1, 128], strides = [1, 1]} : vector<28x128xf32> to vector<1x128xf32>
    %c7_98 = arith.constant 7 : index
    %c0_99 = arith.constant 0 : index
    %c0_100 = arith.constant 0 : index
    %187 = vector.load %arg1[%c7_98, %c0_99, %c0_100] : memref<8x32x128xf32, #tpu.memory_space<vmem>>, vector<1x32x128xf32>
    %188 = vector.shape_cast %187 : vector<1x32x128xf32> to vector<32x128xf32>
    %189 = vector.broadcast %186 : vector<1x128xf32> to vector<32x128xf32>
    %190 = arith.mulf %189, %188 : vector<32x128xf32>
    %191 = arith.addf %185, %190 : vector<32x128xf32>
    %c3_101 = arith.constant 3 : index
    %c0_102 = arith.constant 0 : index
    %c0_103 = arith.constant 0 : index
    %192 = vector.load %arg1[%c3_101, %c0_102, %c0_103] : memref<8x32x128xf32, #tpu.memory_space<vmem>>, vector<1x32x128xf32>
    %193 = vector.shape_cast %192 : vector<1x32x128xf32> to vector<32x128xf32>
    %194 = arith.mulf %193, %191 : vector<32x128xf32>
    %195 = arith.addf %135, %194 : vector<32x128xf32>
    %196 = vector.extract_strided_slice %53 {offsets = [22, 0], sizes = [1, 128], strides = [1, 1]} : vector<28x128xf32> to vector<1x128xf32>
    %c5_104 = arith.constant 5 : index
    %c0_105 = arith.constant 0 : index
    %c0_106 = arith.constant 0 : index
    %197 = vector.load %arg1[%c5_104, %c0_105, %c0_106] : memref<8x32x128xf32, #tpu.memory_space<vmem>>, vector<1x32x128xf32>
    %198 = vector.shape_cast %197 : vector<1x32x128xf32> to vector<32x128xf32>
    %199 = vector.broadcast %196 : vector<1x128xf32> to vector<32x128xf32>
    %200 = arith.mulf %199, %198 : vector<32x128xf32>
    %201 = vector.extract_strided_slice %53 {offsets = [23, 0], sizes = [1, 128], strides = [1, 1]} : vector<28x128xf32> to vector<1x128xf32>
    %c6_107 = arith.constant 6 : index
    %c0_108 = arith.constant 0 : index
    %c0_109 = arith.constant 0 : index
    %202 = vector.load %arg1[%c6_107, %c0_108, %c0_109] : memref<8x32x128xf32, #tpu.memory_space<vmem>>, vector<1x32x128xf32>
    %203 = vector.shape_cast %202 : vector<1x32x128xf32> to vector<32x128xf32>
    %204 = vector.broadcast %201 : vector<1x128xf32> to vector<32x128xf32>
    %205 = arith.mulf %204, %203 : vector<32x128xf32>
    %206 = arith.addf %200, %205 : vector<32x128xf32>
    %207 = vector.extract_strided_slice %53 {offsets = [24, 0], sizes = [1, 128], strides = [1, 1]} : vector<28x128xf32> to vector<1x128xf32>
    %c7_110 = arith.constant 7 : index
    %c0_111 = arith.constant 0 : index
    %c0_112 = arith.constant 0 : index
    %208 = vector.load %arg1[%c7_110, %c0_111, %c0_112] : memref<8x32x128xf32, #tpu.memory_space<vmem>>, vector<1x32x128xf32>
    %209 = vector.shape_cast %208 : vector<1x32x128xf32> to vector<32x128xf32>
    %210 = vector.broadcast %207 : vector<1x128xf32> to vector<32x128xf32>
    %211 = arith.mulf %210, %209 : vector<32x128xf32>
    %212 = arith.addf %206, %211 : vector<32x128xf32>
    %c4_113 = arith.constant 4 : index
    %c0_114 = arith.constant 0 : index
    %c0_115 = arith.constant 0 : index
    %213 = vector.load %arg1[%c4_113, %c0_114, %c0_115] : memref<8x32x128xf32, #tpu.memory_space<vmem>>, vector<1x32x128xf32>
    %214 = vector.shape_cast %213 : vector<1x32x128xf32> to vector<32x128xf32>
    %215 = arith.mulf %214, %212 : vector<32x128xf32>
    %216 = arith.addf %168, %215 : vector<32x128xf32>
    %217 = vector.extract_strided_slice %53 {offsets = [25, 0], sizes = [1, 128], strides = [1, 1]} : vector<28x128xf32> to vector<1x128xf32>
    %c6_116 = arith.constant 6 : index
    %c0_117 = arith.constant 0 : index
    %c0_118 = arith.constant 0 : index
    %218 = vector.load %arg1[%c6_116, %c0_117, %c0_118] : memref<8x32x128xf32, #tpu.memory_space<vmem>>, vector<1x32x128xf32>
    %219 = vector.shape_cast %218 : vector<1x32x128xf32> to vector<32x128xf32>
    %220 = vector.broadcast %217 : vector<1x128xf32> to vector<32x128xf32>
    %221 = arith.mulf %220, %219 : vector<32x128xf32>
    %222 = vector.extract_strided_slice %53 {offsets = [26, 0], sizes = [1, 128], strides = [1, 1]} : vector<28x128xf32> to vector<1x128xf32>
    %c7_119 = arith.constant 7 : index
    %c0_120 = arith.constant 0 : index
    %c0_121 = arith.constant 0 : index
    %223 = vector.load %arg1[%c7_119, %c0_120, %c0_121] : memref<8x32x128xf32, #tpu.memory_space<vmem>>, vector<1x32x128xf32>
    %224 = vector.shape_cast %223 : vector<1x32x128xf32> to vector<32x128xf32>
    %225 = vector.broadcast %222 : vector<1x128xf32> to vector<32x128xf32>
    %226 = arith.mulf %225, %224 : vector<32x128xf32>
    %227 = arith.addf %221, %226 : vector<32x128xf32>
    %c5_122 = arith.constant 5 : index
    %c0_123 = arith.constant 0 : index
    %c0_124 = arith.constant 0 : index
    %228 = vector.load %arg1[%c5_122, %c0_123, %c0_124] : memref<8x32x128xf32, #tpu.memory_space<vmem>>, vector<1x32x128xf32>
    %229 = vector.shape_cast %228 : vector<1x32x128xf32> to vector<32x128xf32>
    %230 = arith.mulf %229, %227 : vector<32x128xf32>
    %231 = arith.addf %195, %230 : vector<32x128xf32>
    %232 = vector.extract_strided_slice %53 {offsets = [27, 0], sizes = [1, 128], strides = [1, 1]} : vector<28x128xf32> to vector<1x128xf32>
    %c7_125 = arith.constant 7 : index
    %c0_126 = arith.constant 0 : index
    %c0_127 = arith.constant 0 : index
    %233 = vector.load %arg1[%c7_125, %c0_126, %c0_127] : memref<8x32x128xf32, #tpu.memory_space<vmem>>, vector<1x32x128xf32>
    %234 = vector.shape_cast %233 : vector<1x32x128xf32> to vector<32x128xf32>
    %235 = vector.broadcast %232 : vector<1x128xf32> to vector<32x128xf32>
    %236 = arith.mulf %235, %234 : vector<32x128xf32>
    %c6_128 = arith.constant 6 : index
    %c0_129 = arith.constant 0 : index
    %c0_130 = arith.constant 0 : index
    %237 = vector.load %arg1[%c6_128, %c0_129, %c0_130] : memref<8x32x128xf32, #tpu.memory_space<vmem>>, vector<1x32x128xf32>
    %238 = vector.shape_cast %237 : vector<1x32x128xf32> to vector<32x128xf32>
    %239 = arith.mulf %238, %236 : vector<32x128xf32>
    %240 = arith.addf %216, %239 : vector<32x128xf32>
    %241 = arith.addf %240, %231 : vector<32x128xf32>
    %c0_131 = arith.constant 0 : index
    %c0_132 = arith.constant 0 : index
    %242 = vector.load %arg5[%c0_131, %c0_132] : memref<1x32xf32, #tpu.memory_space<vmem>>, vector<1x32xf32>
    %cst_133 = arith.constant dense<0.000000e+00> : vector<1x128xf32>
    %243 = tpu.matmul %242, %241, %cst_133 {dimension_numbers = #tpu.dot_dimension_numbers<[1], [0], [0], [1], [0, 0, 1, 1], [], []>} : vector<1x32xf32>, vector<32x128xf32>, vector<1x128xf32> -> vector<1x128xf32>
    %c0_134 = arith.constant 0 : index
    %c0_135 = arith.constant 0 : index
    %244 = vector.load %arg6[%c0_134, %c0_135] : memref<1x1xf32, #tpu.memory_space<vmem>>, vector<1x1xf32>
    %245 = vector.broadcast %244 : vector<1x1xf32> to vector<1x128xf32>
    %246 = arith.addf %243, %245 : vector<1x128xf32>
    %c0_136 = arith.constant 0 : index
    %c0_137 = arith.constant 0 : index
    %247 = vector.load %arg7[%c0_136, %c0_137] : memref<1x128xf32, #tpu.memory_space<vmem>>, vector<1x128xf32>
    tpu.vector_store %arg7[%c0_136, %c0_137], %246 {strides = array<i32>} : memref<1x128xf32, #tpu.memory_space<vmem>>, vector<1x128xf32>,
    return
  }
  func.func @transform_0(%arg0: i32) -> (i32, i32, i32) {
    %c0_i32 = arith.constant 0 : i32
    %c0_i32_0 = arith.constant 0 : i32
    %c0_i32_1 = arith.constant 0 : i32
    return %c0_i32, %c0_i32_0, %arg0 : i32, i32, i32
  }
  func.func @transform_1(%arg0: i32) -> (i32, i32) {
    %c0_i32 = arith.constant 0 : i32
    %c0_i32_0 = arith.constant 0 : i32
    %c0_i32_1 = arith.constant 0 : i32
    return %c0_i32, %c0_i32_0 : i32, i32
  }
  func.func @transform_2(%arg0: i32) -> (i32, i32) {
    %c0_i32 = arith.constant 0 : i32
    %c0_i32_0 = arith.constant 0 : i32
    %c0_i32_1 = arith.constant 0 : i32
    return %c0_i32, %c0_i32_0 : i32, i32
  }
  func.func @transform_3(%arg0: i32) -> (i32, i32) {
    %c0_i32 = arith.constant 0 : i32
    %c0_i32_0 = arith.constant 0 : i32
    %c0_i32_1 = arith.constant 0 : i32
    return %c0_i32, %c0_i32_0 : i32, i32
  }
  func.func @transform_4(%arg0: i32) -> (i32, i32) {
    %c0_i32 = arith.constant 0 : i32
    %c0_i32_0 = arith.constant 0 : i32
    %c0_i32_1 = arith.constant 0 : i32
    return %c0_i32, %c0_i32_0 : i32, i32
  }
  func.func @transform_5(%arg0: i32) -> (i32, i32) {
    %c0_i32 = arith.constant 0 : i32
    %c0_i32_0 = arith.constant 0 : i32
    %c0_i32_1 = arith.constant 0 : i32
    return %c0_i32, %c0_i32_0 : i32, i32
  }
  func.func @transform_6(%arg0: i32) -> (i32, i32) {
    %c0_i32 = arith.constant 0 : i32
    %c0_i32_0 = arith.constant 0 : i32
    return %c0_i32, %arg0 : i32, i32
  }
}

</mosaic_0001>

<bundles_post_ra>
// kernel: tpu_custom_call.1
= control target key start
LH: loop header
LB: loop body
LE: loop exit
PB: predicated region body
PF: predicated region fallthrough
CT: control target
= control target key end

     0   :  { %s1527_s0 = inlined_call_operand.hbm [shape: f32[8,32,128], index: 0, kind: input, shape index: {}]   ;;  %s1528_s1 = inlined_call_operand.vmem [shape: f32[16,32], index: 1, kind: input, shape index: {}]   ;;  %s1529_s2 = inlined_call_operand.vmem [shape: f32[16,1], index: 2, kind: input, shape index: {}]   ;;  %s1530_s3 = inlined_call_operand.vmem [shape: f32[28,16], index: 3, kind: input, shape index: {}]   ;;  %s1531_s4 = inlined_call_operand.vmem [shape: f32[1,32], index: 4, kind: input, shape index: {}]   ;;  %s1532_s5 = inlined_call_operand.<no memory space> [shape: f32[1,1], index: 5, kind: input, shape index: {}]   ;;  %s1533_s6 = inlined_call_operand.hbm [shape: f32[1,128], index: 6, kind: output, shape index: {}]  }
   0x1   :  { %v11_v0 = vstv %s1532_s5 }
   0x2   :  { %12 = vst [vmem:[#allocation2] sm:$0x1] %v11_v0 }
   0x3   :  { %13 = vsyncpa [#allocation4], 0 }
   0x4   :  { %14 = vsyncpa [#allocation5], 0  ;;  %s972_s23 = smov [#allocation3]  }
   0x5   :  { %s20_s24 = sshll.u32 %s972_s23, 4  ;;  %s21_s24 = int_to_ptr.vmem [resolvable:$true] %s20_s24 }
   0x6   :  { %s936_s25 = scalar_lea.vmem %s21_s24, 4096  ;;  %p941_p1 = scmp.lt.s32.totalorder %s21_s24, %s21_s24 }
   0x7   :  { %p937_p0 = scmp.ne.s32.totalorder %s21_s24, %s936_s25  ;;  %p942_p2 = scmp.lt.s32.totalorder %s936_s25, %s936_s25 }
   0x9   :  { %p943_p3 = por %p942_p2, %p941_p1 }
   0xb   :  { %p944_p4 = pnand %p943_p3, %p937_p0 }
   0xd   :  { %947 = shalt.err (!%p944_p4)
}
   0xe   :  { %s973_s26 = smov 128   ;;  %s974_s27 = smov 8  }
   0xf   :  { %26 = dma.hbm_to_vmem [thread:$0]  %s1527_s0, 4096, %s21_s24, [#allocation4], %s973_s26, %s973_s26, %s974_s27  }
  0x10   :  { %968 = dma.done.wait [#allocation4], 4096  }
  0x11   :  { %969 = vsyncadd [#allocation4], 4294963200  ;;  %v975_v1 = vmov 0   ;;  %v1020_v2 = vld [vmem:[#allocation3 + $0xf8] sm:$0xff]  ;;  %v1032_v8 = vld [vmem:[#allocation3 + $0xf0] sm:$0xff]  ;;  %vm169_vm0 = vcmask 261120  }
  0x12   :  { %916 = vset.pattern.permute.xlu0 %v975_v1  ;;  %917 = vset.pattern.permute.xlu1 %v975_v1  ;;  %v1022_v3 = vld [vmem:[#allocation3 + $0xd8] sm:$0xff]  ;;  %v1036_v11 = vld [vmem:[#allocation3 + $0xd0] sm:$0xff]  ;;  %v1050_v20 = vld [vmem:[#allocation3 + $0xe8] sm:$0xff]  ;;  %vm257_vm1 = vcmask 130048   ;;  %vm355_vm2 = vcmask 1043456   ;;  %vm977_vm3 = vmmov 0  }
  0x13   :  { %v1024_v4 = vld [vmem:[#allocation3 + $0xb8] sm:$0xff]  ;;  %v53_v5 = vmul.f32 %v1022_v3, %v1020_v2  ;;  %v57_v6 = vadd.f32 %v1022_v3, %v1020_v2  ;;  %v1038_v12 = vld [vmem:[#allocation3 + $0xb0] sm:$0xff]  ;;  %v52_v14 = vmul.f32 %v1036_v11, %v1032_v8  ;;  %v56_v15 = vadd.f32 %v1036_v11, %v1032_v8  ;;  %1588 = vst [vmem:[#allocation9_spill] sm:$0xff] %v1050_v20  ;;  %v1052_v21 = vld [vmem:[#allocation3 + $0xc8] sm:$0xff]  ;;  %s978_s19 = smov [#allocation6]  }
  0x14   :  { %v1030_v7 = vld [vmem:[#allocation3 + $0x98] sm:$0xff]  ;;  %v1048_v19 = vld [vmem:[#allocation3 + $0x90] sm:$0xff]  ;;  %1589 = vst [vmem:[#allocation10_spill] sm:$0xff] %v1052_v21  ;;  %v51_v25 = vmul.f32 %v1052_v21, %v1050_v20  ;;  %v55_v26 = vadd.f32 %v1052_v21, %v1050_v20  ;;  %v1062_v27 = vld [vmem:[#allocation3 + $0xa8] sm:$0xff]  ;;  %s844_s20 = sshll.u32 %s978_s19, 4  ;;  %s845_s20 = int_to_ptr.vmem [resolvable:$true] %s844_s20 }
  0x15   :  { %v66_v9 = vmul.f32 %v1024_v4, %v57_v6  ;;  %v74_v10 = vadd.f32 %v1024_v4, %v57_v6  ;;  %v1040_v13 = vld [vmem:[#allocation3 + $0x78] sm:$0xff]  ;;  %v65_v23 = vmul.f32 %v1038_v12, %v56_v15  ;;  %v73_v24 = vadd.f32 %v1038_v12, %v56_v15  ;;  %1590 = vst [vmem:[#allocation11_spill] sm:$0xff] %v1062_v27  ;;  %v1066_v31 = vld [vmem:[#allocation3 + $0x70] sm:$0xff]  ;;  %v1073_v37 = vld [vmem:[#allocation3 + $0x88] sm:$0xff]  ;;  %s948_s21 = scalar_lea.vmem %s845_s20, 16  ;;  %s952_s22 = scalar_lea.vmem %s845_s20, 32 }
  0x16   :  { %v1054_v22 = vld [vmem:[#allocation3 + $0x58] sm:$0xff]  ;;  %v64_v36 = vmul.f32 %v1062_v27, %v55_v26  ;;  %1591 = vst [vmem:[#allocation12_spill] sm:$0xff] %v1073_v37  ;;  %v1077_v41 = vld [vmem:[#allocation3 + $0x50] sm:$0xff]  ;;  %v72_v42 = vadd.f32 %v1062_v27, %v55_v26  ;;  %v1092_v54 = vld [vmem:[#allocation3 + $0x68] sm:$0xff]  ;;  %p949_p5 = scmp.ne.s32.totalorder %s845_s20, %s948_s21  ;;  %p953_p6 = scmp.lt.s32.totalorder %s845_s20, %s845_s20 }
  0x17   :  { %v70_v16 = vadd.f32 %v66_v9, %v53_v5  ;;  %v83_v17 = vmul.f32 %v1030_v7, %v74_v10  ;;  %v91_v18 = vadd.f32 %v1030_v7, %v74_v10  ;;  %v1068_v32 = vld [vmem:[#allocation3 + $0x38] sm:$0xff]  ;;  %v69_v33 = vadd.f32 %v65_v23, %v52_v14  ;;  %v1089_v52 = vld [vmem:[#allocation3 + $0x30] sm:$0xff]  ;;  %1592 = vst [vmem:[#allocation13_spill] sm:$0xff] %v1092_v54  ;;  %v158_v55 = vld [vmem:[%s1529_s2 + $0x8] sm:$0xff]  ;;  %p954_p7 = scmp.lt.s32.totalorder %s952_s22, %s948_s21 }
  0x18   :  { %v82_v34 = vmul.f32 %v1048_v19, %v73_v24  ;;  %v90_v35 = vadd.f32 %v1048_v19, %v73_v24  ;;  %v1080_v43 = vld [vmem:[#allocation3 + $0x18] sm:$0xff]  ;;  %v68_v47 = vadd.f32 %v64_v36, %v51_v25  ;;  %v81_v53 = vmul.f32 %v1073_v37, %v72_v42  ;;  %v1101_v60 = vld [vmem:[#allocation3 + $0xe0] sm:$0xff]  ;;  %166 = vperm.xlu0 %916, %v158_v55   ;;  %v1106_v0 = vld [vmem:[#allocation3 + $0x10] sm:$0xff] }
  0x19   :  { %v87_v28 = vadd.f32 %v83_v17, %v70_v16  ;;  %v100_v29 = vmul.f32 %v1040_v13, %v91_v18  ;;  %v108_v30 = vadd.f32 %v1040_v13, %v91_v18  ;;  %v155_v48 = vld [vmem:[%s1528_s1] sm:$0xff]  ;;  %v89_v59 = vadd.f32 %v1073_v37, %v72_v42  ;;  %1593 = vst [vmem:[#allocation14_spill] sm:$0xff] %v1101_v60  ;;  %v1114_v15 = vld [vmem:[#allocation3 + $0x48] sm:$0xff]  ;;  %p955_p8 = por %p954_p7, %p953_p6 }
  0x1a   :  { %v86_v44 = vadd.f32 %v82_v34, %v69_v33  ;;  %v99_v45 = vmul.f32 %v1066_v31, %v90_v35  ;;  %v107_v46 = vadd.f32 %v1066_v31, %v90_v35  ;;  %885 = vmatprep.mubr.msk.f32.mxu0 %vm169_vm0, %v155_v48  ;;  %v1103_v61 = vld [vmem:[#allocation3 + $0xc0] sm:$0xff]  ;;  %1595 = vst [vmem:[#allocation16_spill] sm:$0xff] %v1106_v0  ;;  %1596 = vst [vmem:[#allocation17_spill] sm:$0xff] %v1114_v15 }
  0x1b   :  { %v104_v38 = vadd.f32 %v100_v29, %v87_v28  ;;  %v117_v39 = vmul.f32 %v1054_v22, %v108_v30  ;;  %v125_v40 = vadd.f32 %v1054_v22, %v108_v30  ;;  %1594 = vst [vmem:[#allocation15_spill] sm:$0xff] %v1103_v61  ;;  %v85_v1 = vadd.f32 %v81_v53, %v68_v47  ;;  %v157_v5 = vld [vmem:[%s1529_s2] sm:$0xff]  ;;  %v1124_v29 = vld [vmem:[#allocation3 + $0x28] sm:$0xff]  ;;  %p956_p9 = pnand %p955_p8, %p949_p5 }
  0x1c   :  { %v103_v56 = vadd.f32 %v99_v45, %v86_v44  ;;  %v116_v57 = vmul.f32 %v1077_v41, %v107_v46  ;;  %v124_v58 = vadd.f32 %v1077_v41, %v107_v46  ;;  %v98_v14 = vmul.f32 %v1092_v54, %v89_v59  ;;  %v1116_v16 = vld [vmem:[#allocation3 + $0xa0] sm:$0xff]  ;;  %1598 = vst [vmem:[#allocation19_spill] sm:$0xff] %v1124_v29 }
  0x1d   :  { %v121_v49 = vadd.f32 %v117_v39, %v104_v38  ;;  %v134_v50 = vmul.f32 %v1068_v32, %v125_v40  ;;  %v142_v51 = vadd.f32 %v1068_v32, %v125_v40  ;;  %1597 = vst [vmem:[#allocation18_spill] sm:$0xff] %v1116_v16  ;;  %v106_v18 = vadd.f32 %v1092_v54, %v89_v59  ;;  %v1130_v36 = vld [vmem:[#allocation3 + $0x80] sm:$0xff]  ;;  %v1132_v39 = vld [vmem:[#allocation3 + $0x8] sm:$0xff] }
  0x1e   :  { %v120_v6 = vadd.f32 %v116_v57, %v103_v56  ;;  %v133_v9 = vmul.f32 %v1089_v52, %v124_v58  ;;  %v141_v10 = vadd.f32 %v1089_v52, %v124_v58  ;;  %v50_v23 = vmul.f32 %v1103_v61, %v1101_v60  ;;  %161 = vperm.xlu0 %916, %v157_v5   ;;  %v1136_v46 = vld [vmem:[#allocation3 + $0x60] sm:$0xff] }
  0x1f   :  { %v138_v62 = vadd.f32 %v134_v50, %v121_v49  ;;  %v150_v63 = vmul.f32 %v1080_v43, %v142_v51  ;;  %v54_v24 = vadd.f32 %v1103_v61, %v1101_v60  ;;  %v102_v28 = vadd.f32 %v98_v14, %v85_v1  ;;  %1599 = vst [vmem:[#allocation20_spill] sm:$0xff] %v1130_v36  ;;  %v1141_v51 = vld [vmem:[#allocation3 + $0x40] sm:$0xff] }
  0x20   :  { %v137_v25 = vadd.f32 %v133_v9, %v120_v6  ;;  %v149_v26 = vmul.f32 %v1106_v0, %v141_v10  ;;  %v115_v30 = vmul.f32 %v1114_v15, %v106_v18  ;;  %v123_v33 = vadd.f32 %v1114_v15, %v106_v18  ;;  %1600 = vst [vmem:[#allocation21_spill] sm:$0xff] %v1132_v39  ;;  %v1145_v58 = vld [vmem:[#allocation3 + $0x20] sm:$0xff] }
  0x21   :  { %v154_v17 = vadd.f32 %v150_v63, %v138_v62  ;;  %v63_v34 = vmul.f32 %v1116_v16, %v54_v24  ;;  %v71_v35 = vadd.f32 %v1116_v16, %v54_v24  ;;  %1601 = vst [vmem:[#allocation22_spill] sm:$0xff] %v1136_v46  ;;  %1602 = vst [vmem:[#allocation23_spill] sm:$0xff] %v1141_v51  ;;  %v1149_v1 = vld [vmem:[#allocation3] sm:$0xff] }
  0x22   :  { %v153_v38 = vadd.f32 %v149_v26, %v137_v25  ;;  %v119_v40 = vadd.f32 %v115_v30, %v102_v28  ;;  %v132_v42 = vmul.f32 %v1124_v29, %v123_v33  ;;  %v140_v44 = vadd.f32 %v1124_v29, %v123_v33  ;;  %1603 = vst [vmem:[#allocation24_spill] sm:$0xff] %v1145_v58  ;;  %v156_v18 = vld [vmem:[%s1528_s1 + $0x8] sm:$0xff] }
  0x23   :  { %877 = vmatprep.subr.mxu0 %v154_v17  ;;  %v67_v45 = vadd.f32 %v63_v34, %v50_v23  ;;  %v80_v47 = vmul.f32 %v1130_v36, %v71_v35  ;;  %v88_v48 = vadd.f32 %v1130_v36, %v71_v35  ;;  %1604 = vst [vmem:[#allocation25_spill] sm:$0xff] %v1149_v1  ;;  %v253_v23 = vld [vmem:[%s1530_s3] sm:$0xff] }
  0x24   :  { %878 = vmatpush3.msra.mxu0 %v154_v17  ;;  %v136_v49 = vadd.f32 %v132_v42, %v119_v40  ;;  %v148_v50 = vmul.f32 %v1132_v39, %v140_v44  ;;  %892 = vmatprep.mubr.msk.f32.mxu1 %vm257_vm1, %v253_v23  ;;  %v255_v40 = vld [vmem:[%s1530_s3 + $0x10] sm:$0xff]  ;;  %v256_v42 = vld [vmem:[%s1530_s3 + $0x18] sm:$0xf]  ;;  %v1534_v44 = vmov 0.0  }
  0x25   :  { %879 = vmatprep.subr.mxu0 %v153_v38  ;;  %v84_v53 = vadd.f32 %v80_v47, %v67_v45  ;;  %v97_v55 = vmul.f32 %v1136_v46, %v88_v48  ;;  %v105_v56 = vadd.f32 %v1136_v46, %v88_v48 }
  0x26   :  { %880 = vmatpush3.msra.mxu0 %v153_v38  ;;  %v152_v57 = vadd.f32 %v148_v50, %v136_v49  ;;  %v254_v38 = vld [vmem:[%s1530_s3 + $0x8] sm:$0xff] }
  0x27   :  { %v101_v59 = vadd.f32 %v97_v55, %v84_v53  ;;  %v114_v62 = vmul.f32 %v1141_v51, %v105_v56  ;;  %v122_v63 = vadd.f32 %v1141_v51, %v105_v56 }
  0x28   :  { %881 = vmatprep.subr.mxu0 %v152_v57 }
  0x29   :  { %882 = vmatpush3.msra.mxu0 %v152_v57  ;;  %v118_v5 = vadd.f32 %v114_v62, %v101_v59  ;;  %v131_v6 = vmul.f32 %v1145_v58, %v122_v63  ;;  %v139_v9 = vadd.f32 %v1145_v58, %v122_v63 }
  0x2b   :  { %v135_v10 = vadd.f32 %v131_v6, %v118_v5  ;;  %v147_v14 = vmul.f32 %v1149_v1, %v139_v9 }
  0x2d   :  { %v151_v17 = vadd.f32 %v147_v14, %v135_v10 }
  0x2f   :  { %883 = vmatprep.subr.mxu0 %v151_v17 }
  0x30   :  { %884 = vmatpush3.msra.mxu0 %v151_v17 }
  0x31   :  { %886 = vmatmul.mubr.msk.f32.vlgmr.msra.gmra.mxu0 %vm169_vm0, %v156_v18 }
  0x93   :  { %v167_v24 = vpop.permute.xlu0 %166 }
  0x99   :  { %v162_v28 = vpop.permute.xlu0 %161 }
  0xf1   :  { %v887_v25 = vpop.f32.mrf.mxu0 }
  0xf2   :  { %v248_v26 = vadd.f32 %v887_v25, %v167_v24 }
  0xf3   :  { %v242_v30 = vpop.f32.mrf.mxu0 }
  0xf4   :  { %v252_v33 = vmax.f32 %v248_v26, 0.0  ;;  %v243_v34 = vadd.f32 %v242_v30, %v162_v28  ;;  %v754_v26 = vld [vmem:[#allocation2] sm:$0x1] }
  0xf5   :  { %757 = vperm.xlu1 %917, %v754_v26  }
  0xf6   :  { %v251_v35 = vmax.f32 %v243_v34, 0.0  ;;  %888 = vmatprep.subr.mxu1 %v252_v33 }
  0xf7   :  { %889 = vmatpush3.msra.mxu1 %v252_v33 }
  0xf8   :  { %890 = vmatprep.subr.mxu1 %v251_v35 }
  0xf9   :  { %891 = vmatpush3.msra.mxu1 %v251_v35 }
  0xfa   :  { %893 = vmatmul.mubr.msk.f32.vlgmr.msra.gmra.mxu1 %vm257_vm1, %v254_v38  ;;  %898 = vmatprep.subr.mxu1 %v1534_v44 }
  0xfb   :  { %895 = vmatprep.mubr.msk.f32.mxu1 %vm257_vm1, %v255_v40 }
  0xfe   :  { %896 = vmatmul.mubr.msk.f32.gmra.mxu1 %vm257_vm1, %v256_v42 }
  0xff   :  { %906 = vmatprep.mubr.msk.f32.mxu1 %vm977_vm3, %v1534_v44 }
 0x1ba   :  { %v894_v45 = vpop.f32.mrf.mxu1 }
 0x1bc   :  { %v336_v47 = vpop.f32.mrf.mxu1 }
 0x1bd   :  { %v357_v53 = vmax.f32 %v336_v47, %v894_v45 }
 0x1be   :  { %v897_v48 = vpop.f32.mrf.mxu1 }
 0x1bf   :  { %v356_v49 = vsel %vm355_vm2, %v897_v48, -inf }
 0x1c0   :  { %v346_v50 = vpop.f32.mrf.mxu1 }
 0x1c1   :  { %v358_v55 = vmax.f32 %v346_v50, %v356_v49 }
 0x1c3   :  { %v359_v56 = vmax.f32 %v357_v53, %v358_v55  ;;  %v393_v55 = vlaneseq }
 0x1c5   :  { %v360_v57 = vrot.slane %v359_v56, 4 }
 0x1c7   :  { %v361_v59 = vmax.f32 %v359_v56, %v360_v57  ;;  %v394_v56 = vshrl.u32 %v393_v55, 7 }
 0x1c9   :  { %v362_v62 = vrot.slane %v361_v59, 2  ;;  %v1178_v57 = vsub.s32 0, %v394_v56 }
 0x1cb   :  { %v363_v63 = vmax.f32 %v361_v59, %v362_v62  ;;  %1605 = vst [vmem:[#allocation26_spill] sm:$0xff] %v1178_v57  ;;  %v1180_v59 = vsub.s32 1, %v394_v56  ;;  %v1182_v62 = vsub.s32 2, %v394_v56 }
 0x1cd   :  { %v364_v5 = vrot.slane %v363_v63, 1 }
 0x1cf   :  { %v365_v6 = vmax.f32 %v363_v63, %v364_v5  ;;  %v1184_v63 = vsub.s32 3, %v394_v56 }
 0x1d1   :  { %v366_v9 = vsub.f32 %v336_v47, %v365_v6  ;;  %v367_v10 = vsub.f32 %v894_v45, %v365_v6  ;;  %v368_v14 = vsub.f32 %v346_v50, %v365_v6  ;;  %v369_v17 = vsub.f32 %v897_v48, %v365_v6 }
 0x1d2   :  { %v439_v6 = vsub.s32 4, %v394_v56 }
 0x1d3   :  { %v370_v18 = vmul.f32 1.442695, %v366_v9  ;;  %v372_v23 = vmul.f32 1.442695, %v367_v10  ;;  %v374_v24 = vmul.f32 1.442695, %v368_v14 }
 0x1d4   :  { %v376_v25 = vmul.f32 1.442695, %v369_v17  ;;  %v451_v9 = vsub.s32 5, %v394_v56  ;;  %v463_v10 = vsub.s32 6, %v394_v56  ;;  %v479_v14 = vsub.s32 7, %v394_v56 }
 0x1d5   :  { %918 = vpow2.f32 %v370_v18 }
 0x1d6   :  { %920 = vpow2.f32 %v372_v23 }
 0x1d7   :  { %922 = vpow2.f32 %v374_v24 }
 0x1d8   :  { %924 = vpow2.f32 %v376_v25 }
 0x1e2   :  { %v919_v28 = vpop.eup %918 }
 0x1e3   :  { %v921_v30 = vpop.eup %920 }
 0x1e4   :  { %v923_v33 = vpop.eup %922  ;;  %v378_v34 = vadd.f32 %v921_v30, %v919_v28 }
 0x1e5   :  { %v925_v35 = vpop.eup %924 }
 0x1e6   :  { %v379_v38 = vadd.f32 %v923_v33, %v378_v34  ;;  %v380_v40 = vsel %vm355_vm2, %v925_v35, 0.0 }
 0x1e8   :  { %v381_v42 = vadd.f32 %v380_v40, %v379_v38 }
 0x1ea   :  { %v382_v45 = vrot.slane %v381_v42, 4 }
 0x1ec   :  { %v383_v47 = vadd.f32 %v382_v45, %v381_v42 }
 0x1ee   :  { %v384_v48 = vrot.slane %v383_v47, 2 }
 0x1f0   :  { %v385_v49 = vadd.f32 %v384_v48, %v383_v47 }
 0x1f2   :  { %v386_v50 = vrot.slane %v385_v49, 1 }
 0x1f4   :  { %v387_v53 = vadd.f32 %v386_v50, %v385_v49 }
 0x1f6   :  { %926 = vrcp.f32 %v387_v53 }
 0x203   :  { %v927_v5 = vpop.eup %926 }
 0x204   :  { %v389_v17 = vmul.f32 %v927_v5, %v919_v28  ;;  %v390_v18 = vmul.f32 %v927_v5, %v921_v30  ;;  %v391_v23 = vmul.f32 %v927_v5, %v923_v33  ;;  %v1186_v24 = vmul.f32 %v927_v5, %v925_v35 }
 0x206   :  { %v1189_v25 = vrot.slane %v389_v17, %v1178_v57  ;;  %v1192_v26 = vrot.slane %v389_v17, %v1180_v59  ;;  %v1195_v34 = vrot.slane %v389_v17, %v1182_v62  ;;  %v1198_v38 = vrot.slane %v389_v17, %v1184_v63 }
 0x207   :  { %v1200_v40 = vrot.slane %v389_v17, %v439_v6  ;;  %v1202_v42 = vrot.slane %v389_v17, %v451_v9  ;;  %v1204_v28 = vrot.slane %v389_v17, %v463_v10  ;;  %v1206_v30 = vrot.slane %v389_v17, %v479_v14 }
 0x208   :  { %v400_v33 = vmul.f32 %v1189_v25, %v1068_v32  ;;  %v408_v35 = vmul.f32 %v1192_v26, %v1054_v22  ;;  %v420_v45 = vmul.f32 %v1195_v34, %v1040_v13  ;;  %v432_v47 = vmul.f32 %v1198_v38, %v1030_v7 }
 0x209   :  { %v444_v48 = vmul.f32 %v1200_v40, %v1024_v4  ;;  %v456_v49 = vmul.f32 %v1202_v42, %v1022_v3  ;;  %v468_v50 = vmul.f32 %v1204_v28, %v1020_v2  ;;  %v484_v53 = vmul.f32 %v1206_v30, %v1054_v22 }
 0x20a   :  { %v412_v55 = vadd.f32 %v408_v35, %v400_v33  ;;  %v1225_v56 = vrot.slane %v390_v18, %v1178_v57  ;;  %v1228_v5 = vrot.slane %v390_v18, %v1180_v59  ;;  %v1231_v17 = vrot.slane %v390_v18, %v1182_v62 }
 0x20b   :  { %v1234_v44 = vrot.slane %v390_v18, %v1184_v63  ;;  %v1236_v1 = vrot.slane %v390_v18, %v439_v6  ;;  %v1238_v60 = vrot.slane %v390_v18, %v451_v9  ;;  %v1240_v61 = vrot.slane %v390_v18, %v463_v10 }
 0x20c   :  { %v424_v16 = vadd.f32 %v420_v45, %v412_v55  ;;  %v492_v33 = vmul.f32 %v1225_v56, %v1040_v13  ;;  %v504_v35 = vmul.f32 %v1228_v5, %v1030_v7  ;;  %v516_v36 = vmul.f32 %v1231_v17, %v1024_v4 }
 0x20d   :  { %1606 = vst [vmem:[#allocation27_spill] sm:$0xff] %v1238_v60  ;;  %1607 = vst [vmem:[#allocation28_spill] sm:$0xff] %v1240_v61  ;;  %v528_v46 = vmul.f32 %v1234_v44, %v1022_v3  ;;  %v540_v51 = vmul.f32 %v1236_v1, %v1020_v2  ;;  %v556_v39 = vmul.f32 %v1238_v60, %v1040_v13 }
 0x20e   :  { %v564_v45 = vmul.f32 %v1240_v61, %v1030_v7  ;;  %v436_v55 = vadd.f32 %v432_v47, %v424_v16  ;;  %v496_v58 = vadd.f32 %v492_v33, %v484_v53  ;;  %v1256_v20 = vrot.slane %v390_v18, %v479_v14 }
 0x20f   :  { %v1259_v21 = vrot.slane %v391_v23, %v1178_v57  ;;  %v1262_v37 = vrot.slane %v391_v23, %v1180_v59  ;;  %v1265_v54 = vrot.slane %v391_v23, %v1182_v62  ;;  %v1268_v15 = vrot.slane %v391_v23, %v1184_v63 }
 0x210   :  { %1608 = vst [vmem:[#allocation29_spill] sm:$0xff] %v1256_v20  ;;  %v568_v27 = vadd.f32 %v564_v45, %v556_v39  ;;  %v448_v0 = vadd.f32 %v444_v48, %v436_v55  ;;  %v508_v29 = vadd.f32 %v504_v35, %v496_v58  ;;  %v576_v16 = vmul.f32 %v1256_v20, %v1024_v4 }
 0x211   :  { %1609 = vst [vmem:[#allocation30_spill] sm:$0xff] %v1259_v21  ;;  %1610 = vst [vmem:[#allocation31_spill] sm:$0xff] %v1262_v37  ;;  %v588_v18 = vmul.f32 %v1259_v21, %v1022_v3  ;;  %v600_v39 = vmul.f32 %v1262_v37, %v1020_v2  ;;  %v620_v47 = vmul.f32 %v1265_v54, %v1030_v7 }
 0x212   :  { %1611 = vst [vmem:[#allocation32_spill] sm:$0xff] %v1265_v54  ;;  %1612 = vst [vmem:[#allocation33_spill] sm:$0xff] %v1268_v15  ;;  %v628_v53 = vmul.f32 %v1268_v15, %v1024_v4  ;;  %v1280_v33 = vrot.slane %v391_v23, %v439_v6  ;;  %v460_v45 = vadd.f32 %v456_v49, %v448_v0 }
 0x213   :  { %v520_v48 = vadd.f32 %v516_v36, %v508_v29  ;;  %v580_v58 = vadd.f32 %v576_v16, %v568_v27  ;;  %v1282_v35 = vrot.slane %v391_v23, %v451_v9  ;;  %v1286_v20 = vrot.slane %v391_v23, %v463_v10 }
 0x214   :  { %v632_v55 = vadd.f32 %v628_v53, %v620_v47  ;;  %v640_v21 = vmul.f32 %v1280_v33, %v1022_v3  ;;  %v1288_v37 = vrot.slane %v391_v23, %v479_v14  ;;  %v472_v61 = vadd.f32 %v468_v50, %v460_v45 }
 0x215   :  { %v532_v54 = vadd.f32 %v528_v46, %v520_v48  ;;  %v592_v60 = vadd.f32 %v588_v18, %v580_v58  ;;  %v652_v6 = vmul.f32 %v1282_v35, %v1020_v2  ;;  %v672_v27 = vmul.f32 %v1286_v20, %v1024_v4 }
 0x216   :  { %v644_v15 = vadd.f32 %v640_v21, %v632_v55  ;;  %v680_v0 = vmul.f32 %v1288_v37, %v1022_v3  ;;  %v1298_v29 = vrot.slane %v1186_v24, %v1178_v57  ;;  %v476_v36 = vmul.f32 %v472_v61, %v1080_v43 }
 0x217   :  { %v544_v9 = vadd.f32 %v540_v51, %v532_v54  ;;  %v604_v10 = vadd.f32 %v600_v39, %v592_v60  ;;  %v1303_v46 = vrot.slane %v1186_v24, %v1180_v59  ;;  %v1309_v49 = vrot.slane %v1186_v24, %v1182_v62 }
 0x218   :  { %1613 = vst [vmem:[#allocation34_spill] sm:$0xff] %v1298_v29  ;;  %v656_v14 = vadd.f32 %v652_v6, %v644_v15  ;;  %v684_v21 = vadd.f32 %v680_v0, %v672_v27  ;;  %v692_v23 = vmul.f32 %v1298_v29, %v1020_v2  ;;  %v1317_v54 = vrot.slane %v1186_v24, %v1184_v63 }
 0x219   :  { %1614 = vst [vmem:[#allocation35_spill] sm:$0xff] %v1303_v46  ;;  %1615 = vst [vmem:[#allocation36_spill] sm:$0xff] %v1309_v49  ;;  %v548_v50 = vmul.f32 %v544_v9, %v1068_v32  ;;  %v608_v16 = vmul.f32 %v604_v10, %v1054_v22  ;;  %v712_v43 = vmul.f32 %v1303_v46, %v1022_v3 }
 0x21a   :  { %v660_v60 = vmul.f32 %v656_v14, %v1040_v13  ;;  %v696_v61 = vadd.f32 %v692_v23, %v684_v21  ;;  %v720_v15 = vmul.f32 %v1309_v49, %v1020_v2  ;;  %v399_v51 = vmul.f32 %v1189_v25, %v1089_v52  ;;  %v1616_v21 = vld [vmem:[#allocation27_spill] sm:$0xff] }
 0x21b   :  { %v612_v59 = vadd.f32 %v608_v16, %v476_v36  ;;  %v740_v22 = vmul.f32 %v1317_v54, %v1020_v2  ;;  %v407_v32 = vmul.f32 %v1192_v26, %v1077_v41  ;;  %v419_v62 = vmul.f32 %v1195_v34, %v1066_v31 }
 0x21c   :  { %v664_v63 = vadd.f32 %v660_v60, %v548_v50  ;;  %v700_v13 = vmul.f32 %v696_v61, %v1030_v7  ;;  %v724_v24 = vadd.f32 %v720_v15, %v712_v43  ;;  %v431_v18 = vmul.f32 %v1198_v38, %v1048_v19  ;;  %v1617_v50 = vld [vmem:[#allocation28_spill] sm:$0xff]  ;;  %v1618_v60 = vld [vmem:[#allocation29_spill] sm:$0xff]  ;;  %v1619_v15 = vld [vmem:[#allocation30_spill] sm:$0xff] }
 0x21d   :  { %v744_v39 = vmul.f32 %v740_v22, %v1022_v3  ;;  %v411_v47 = vadd.f32 %v407_v32, %v399_v51  ;;  %v443_v53 = vmul.f32 %v1200_v40, %v1038_v12  ;;  %v455_v2 = vmul.f32 %v1202_v42, %v1036_v11 }
 0x21e   :  { %v704_v45 = vadd.f32 %v700_v13, %v612_v59  ;;  %v728_v48 = vmul.f32 %v724_v24, %v1024_v4  ;;  %v467_v58 = vmul.f32 %v1204_v28, %v1032_v8  ;;  %v483_v7 = vmul.f32 %v1206_v30, %v1077_v41  ;;  %v1620_v59 = vld [vmem:[#allocation31_spill] sm:$0xff]  ;;  %v1621_v13 = vld [vmem:[#allocation32_spill] sm:$0xff] }
 0x21f   :  { %v423_v55 = vadd.f32 %v419_v62, %v411_v47  ;;  %v491_v3 = vmul.f32 %v1225_v56, %v1066_v31  ;;  %v503_v6 = vmul.f32 %v1228_v5, %v1048_v19  ;;  %v515_v27 = vmul.f32 %v1231_v17, %v1038_v12 }
 0x220   :  { %v732_v0 = vadd.f32 %v728_v48, %v664_v63  ;;  %v748_v36 = vadd.f32 %v744_v39, %v704_v45  ;;  %v527_v4 = vmul.f32 %v1234_v44, %v1036_v11  ;;  %v539_v9 = vmul.f32 %v1236_v1, %v1032_v8 }
 0x221   :  { %v435_v10 = vadd.f32 %v431_v18, %v423_v55  ;;  %v495_v14 = vadd.f32 %v491_v3, %v483_v7  ;;  %v555_v23 = vmul.f32 %v1616_v21, %v1066_v31  ;;  %v563_v16 = vmul.f32 %v1617_v50, %v1048_v19  ;;  %v1622_v18 = vld [vmem:[#allocation33_spill] sm:$0xff] }
 0x222   :  { %v752_v43 = vadd.f32 %v748_v36, %v732_v0  ;;  %v575_v61 = vmul.f32 %v1618_v60, %v1038_v12  ;;  %v587_v51 = vmul.f32 %v1619_v15, %v1036_v11  ;;  %v599_v22 = vmul.f32 %v1620_v59, %v1032_v8 }
 0x223   :  { %v447_v32 = vadd.f32 %v443_v53, %v435_v10  ;;  %v507_v62 = vadd.f32 %v503_v6, %v495_v14  ;;  %v567_v63 = vadd.f32 %v563_v16, %v555_v23  ;;  %v619_v24 = vmul.f32 %v1621_v13, %v1048_v19 }
 0x224   :  { %899 = vmatpush3.msra.mxu1 %v752_v43  ;;  %v627_v39 = vmul.f32 %v1622_v18, %v1038_v12  ;;  %v639_v47 = vmul.f32 %v1280_v33, %v1036_v11  ;;  %v651_v45 = vmul.f32 %v1282_v35, %v1032_v8  ;;  %v671_v48 = vmul.f32 %v1286_v20, %v1038_v12 }
 0x225   :  { %v1623_v7 = vmov 0.0   ;;  %v459_v53 = vadd.f32 %v455_v2, %v447_v32  ;;  %v519_v55 = vadd.f32 %v515_v27, %v507_v62  ;;  %v579_v3 = vadd.f32 %v575_v61, %v567_v63  ;;  %v1624_v32 = vld [vmem:[#allocation19_spill] sm:$0xff]  ;;  %v1625_v63 = vld [vmem:[#allocation16_spill] sm:$0xff] }
 0x226   :  { %900 = vmatprep.subr.mxu1 %v1623_v7  ;;  %v679_v6 = vmul.f32 %v1288_v37, %v1036_v11  ;;  %v631_v0 = vadd.f32 %v627_v39, %v619_v24  ;;  %v691_v36 = vmul.f32 %v1298_v29, %v1032_v8  ;;  %v711_v10 = vmul.f32 %v1303_v46, %v1036_v11 }
 0x227   :  { %v719_v14 = vmul.f32 %v1309_v49, %v1032_v8  ;;  %v471_v23 = vadd.f32 %v467_v58, %v459_v53  ;;  %v531_v16 = vadd.f32 %v527_v4, %v519_v55  ;;  %v591_v43 = vadd.f32 %v587_v51, %v579_v3  ;;  %v1626_v4 = vld [vmem:[#allocation17_spill] sm:$0xff] }
 0x228   :  { %v683_v57 = vadd.f32 %v679_v6, %v671_v48  ;;  %v643_v2 = vadd.f32 %v639_v47, %v631_v0  ;;  %v739_v61 = vmul.f32 %v1317_v54, %v1032_v8  ;;  %v398_v62 = vmul.f32 %v1189_v25, %v1624_v32  ;;  %v1627_v53 = vld [vmem:[#allocation13_spill] sm:$0xff]  ;;  %v1630_v6 = vld [vmem:[#allocation10_spill] sm:$0xff] }
 0x229   :  { %v723_v27 = vadd.f32 %v719_v14, %v711_v10  ;;  %v475_v24 = vmul.f32 %v471_v23, %v1625_v63  ;;  %v543_v39 = vadd.f32 %v539_v9, %v531_v16  ;;  %v603_v7 = vadd.f32 %v599_v22, %v591_v43  ;;  %v1628_v22 = vld [vmem:[#allocation12_spill] sm:$0xff]  ;;  %v1631_v0 = vld [vmem:[#allocation9_spill] sm:$0xff] }
 0x22a   :  { %v695_v46 = vadd.f32 %v691_v36, %v683_v57  ;;  %v655_v29 = vadd.f32 %v651_v45, %v643_v2  ;;  %v743_v58 = vmul.f32 %v739_v61, %v1036_v11  ;;  %v406_v51 = vmul.f32 %v1192_v26, %v1626_v4  ;;  %v1629_v45 = vld [vmem:[#allocation11_spill] sm:$0xff] }
 0x22b   :  { %v727_v49 = vmul.f32 %v723_v27, %v1038_v12  ;;  %v547_v47 = vmul.f32 %v543_v39, %v1089_v52  ;;  %v607_v8 = vmul.f32 %v603_v7, %v1077_v41  ;;  %v418_v55 = vmul.f32 %v1195_v34, %v1627_v53 }
 0x22c   :  { %v699_v48 = vmul.f32 %v695_v46, %v1048_v19  ;;  %v659_v9 = vmul.f32 %v655_v29, %v1066_v31  ;;  %v410_v57 = vadd.f32 %v406_v51, %v398_v62  ;;  %v430_v12 = vmul.f32 %v1198_v38, %v1628_v22 }
 0x22d   :  { %v442_v11 = vmul.f32 %v1200_v40, %v1629_v45  ;;  %v611_v3 = vadd.f32 %v607_v8, %v475_v24  ;;  %v454_v52 = vmul.f32 %v1202_v42, %v1630_v6  ;;  %v466_v41 = vmul.f32 %v1204_v28, %v1631_v0 }
 0x22e   :  { %v482_v19 = vmul.f32 %v1206_v30, %v1626_v4  ;;  %v663_v46 = vadd.f32 %v659_v9, %v547_v47  ;;  %v422_v7 = vadd.f32 %v418_v55, %v410_v57  ;;  %v490_v31 = vmul.f32 %v1225_v56, %v1627_v53 }
 0x22f   :  { %v502_v29 = vmul.f32 %v1228_v5, %v1628_v22  ;;  %v703_v36 = vadd.f32 %v699_v48, %v611_v3  ;;  %v514_v10 = vmul.f32 %v1231_v17, %v1629_v45  ;;  %v526_v14 = vmul.f32 %v1234_v44, %v1630_v6 }
 0x230   :  { %v538_v23 = vmul.f32 %v1236_v1, %v1631_v0  ;;  %v731_v16 = vadd.f32 %v727_v49, %v663_v46  ;;  %v434_v43 = vadd.f32 %v430_v12, %v422_v7  ;;  %v494_v2 = vadd.f32 %v490_v31, %v482_v19  ;;  %v1632_v7 = vld [vmem:[#allocation34_spill] sm:$0xff] }
 0x231   :  { %v554_v27 = vmul.f32 %v1616_v21, %v1627_v53  ;;  %v747_v61 = vadd.f32 %v743_v58, %v703_v36  ;;  %v562_v62 = vmul.f32 %v1617_v50, %v1628_v22  ;;  %v574_v63 = vmul.f32 %v1618_v60, %v1629_v45 }
 0x232   :  { %v586_v24 = vmul.f32 %v1619_v15, %v1630_v6  ;;  %v446_v39 = vadd.f32 %v442_v11, %v434_v43  ;;  %v506_v51 = vadd.f32 %v502_v29, %v494_v2  ;;  %v598_v49 = vmul.f32 %v1620_v59, %v1631_v0  ;;  %v1635_v43 = vld [vmem:[#allocation36_spill] sm:$0xff] }
 0x233   :  { %v618_v47 = vmul.f32 %v1621_v13, %v1628_v22  ;;  %v751_v8 = vadd.f32 %v747_v61, %v731_v16  ;;  %v566_v48 = vadd.f32 %v562_v62, %v554_v27  ;;  %v626_v58 = vmul.f32 %v1622_v18, %v1629_v45 }
 0x234   :  { %v638_v55 = vmul.f32 %v1280_v33, %v1630_v6  ;;  %v458_v9 = vadd.f32 %v454_v52, %v446_v39  ;;  %v518_v57 = vadd.f32 %v514_v10, %v506_v51  ;;  %v650_v12 = vmul.f32 %v1282_v35, %v1631_v0  ;;  %v1634_v10 = vld [vmem:[#allocation35_spill] sm:$0xff] }
 0x235   :  { %v670_v11 = vmul.f32 %v1286_v20, %v1629_v45  ;;  %901 = vmatpush3.msra.mxu1 %v751_v8  ;;  %v578_v3 = vadd.f32 %v574_v63, %v566_v48  ;;  %v630_v19 = vadd.f32 %v626_v58, %v618_v47  ;;  %v678_v46 = vmul.f32 %v1288_v37, %v1630_v6  ;;  %v1636_v47 = vld [vmem:[#allocation24_spill] sm:$0xff]  ;;  %v1637_v48 = vld [vmem:[#allocation21_spill] sm:$0xff] }
 0x236   :  { %v690_v31 = vmul.f32 %v1632_v7, %v1631_v0  ;;  %v1633_v29 = vmov 0.0   ;;  %v470_v36 = vadd.f32 %v466_v41, %v458_v9  ;;  %v530_v52 = vadd.f32 %v526_v14, %v518_v57 }
 0x237   :  { %902 = vmatprep.subr.mxu1 %v1633_v29  ;;  %v710_v16 = vmul.f32 %v1634_v10, %v1630_v6  ;;  %v718_v2 = vmul.f32 %v1635_v43, %v1631_v0  ;;  %v590_v27 = vadd.f32 %v586_v24, %v578_v3  ;;  %v642_v61 = vadd.f32 %v638_v55, %v630_v19  ;;  %v1638_v55 = vld [vmem:[#allocation23_spill] sm:$0xff]  ;;  %v1639_v3 = vld [vmem:[#allocation22_spill] sm:$0xff]  ;;  %v1640_v19 = vld [vmem:[#allocation20_spill] sm:$0xff] }
 0x238   :  { %v682_v62 = vadd.f32 %v678_v46, %v670_v11  ;;  %v738_v63 = vmul.f32 %v1317_v54, %v1631_v0  ;;  %v542_v39 = vadd.f32 %v538_v23, %v530_v52  ;;  %v397_v8 = vmul.f32 %v1189_v25, %v1636_v47  ;;  %v1641_v46 = vld [vmem:[#allocation18_spill] sm:$0xff] }
 0x239   :  { %v722_v51 = vadd.f32 %v718_v2, %v710_v16  ;;  %v474_v41 = vmul.f32 %v470_v36, %v1637_v48  ;;  %v602_v14 = vadd.f32 %v598_v49, %v590_v27  ;;  %v654_v58 = vadd.f32 %v650_v12, %v642_v61 }
 0x23a   :  { %v694_v9 = vadd.f32 %v690_v31, %v682_v62  ;;  %v546_v57 = vmul.f32 %v542_v39, %v1624_v32  ;;  %v742_v24 = vmul.f32 %v738_v63, %v1630_v6  ;;  %v405_v11 = vmul.f32 %v1192_v26, %v1638_v55  ;;  %v1642_v6 = vld [vmem:[#allocation15_spill] sm:$0xff] }
 0x23b   :  { %v726_v7 = vmul.f32 %v722_v51, %v1629_v45  ;;  %v606_v0 = vmul.f32 %v602_v14, %v1626_v4  ;;  %v658_v23 = vmul.f32 %v654_v58, %v1627_v53  ;;  %v417_v49 = vmul.f32 %v1195_v34, %v1639_v3  ;;  %v1643_v34 = vld [vmem:[#allocation14_spill] sm:$0xff] }
 0x23c   :  { %v698_v25 = vmul.f32 %v694_v9, %v1628_v22  ;;  %v409_v12 = vadd.f32 %v405_v11, %v397_v8  ;;  %v429_v32 = vmul.f32 %v1198_v38, %v1640_v19  ;;  %v441_v45 = vmul.f32 %v1200_v40, %v1641_v46  ;;  %v1644_v11 = vld [vmem:[#allocation34_spill] sm:$0xff] }
 0x23d   :  { %v453_v31 = vmul.f32 %v1202_v42, %v1642_v6  ;;  %v610_v26 = vadd.f32 %v606_v0, %v474_v41  ;;  %v662_v36 = vadd.f32 %v658_v23, %v546_v57  ;;  %v481_v4 = vmul.f32 %v1206_v30, %v1638_v55 }
 0x23e   :  { %v489_v53 = vmul.f32 %v1225_v56, %v1639_v3  ;;  %v421_v22 = vadd.f32 %v417_v49, %v409_v12  ;;  %v465_v52 = vmul.f32 %v1204_v28, %v1643_v34  ;;  %v501_v38 = vmul.f32 %v1228_v5, %v1640_v19 }
 0x23f   :  { %v513_v40 = vmul.f32 %v1231_v17, %v1641_v46  ;;  %v702_v16 = vadd.f32 %v698_v25, %v610_v26  ;;  %v730_v42 = vadd.f32 %v726_v7, %v662_v36  ;;  %v525_v27 = vmul.f32 %v1234_v44, %v1642_v6 }
 0x240   :  { %v493_v2 = vadd.f32 %v489_v53, %v481_v4  ;;  %v433_v30 = vadd.f32 %v429_v32, %v421_v22  ;;  %v537_v56 = vmul.f32 %v1236_v1, %v1643_v34  ;;  %v553_v61 = vmul.f32 %v1616_v21, %v1639_v3 }
 0x241   :  { %v561_v28 = vmul.f32 %v1617_v50, %v1640_v19  ;;  %v746_v5 = vadd.f32 %v742_v24, %v702_v16  ;;  %v573_v17 = vmul.f32 %v1618_v60, %v1641_v46  ;;  %v585_v7 = vmul.f32 %v1619_v15, %v1642_v6 }
 0x242   :  { %v505_v62 = vadd.f32 %v501_v38, %v493_v2  ;;  %v445_v63 = vadd.f32 %v441_v45, %v433_v30  ;;  %v617_v39 = vmul.f32 %v1621_v13, %v1640_v19  ;;  %v625_v1 = vmul.f32 %v1622_v18, %v1641_v46 }
 0x243   :  { %v565_v44 = vadd.f32 %v561_v28, %v553_v61  ;;  %v750_v21 = vadd.f32 %v746_v5, %v730_v42  ;;  %v597_v50 = vmul.f32 %v1620_v59, %v1643_v34  ;;  %v637_v8 = vmul.f32 %v1280_v33, %v1642_v6 }
 0x244   :  { %v517_v51 = vadd.f32 %v513_v40, %v505_v62  ;;  %v457_v60 = vadd.f32 %v453_v31, %v445_v63  ;;  %v629_v41 = vadd.f32 %v625_v1, %v617_v39  ;;  %v669_v15 = vmul.f32 %v1286_v20, %v1641_v46 }
 0x245   :  { %v577_v48 = vadd.f32 %v573_v17, %v565_v44  ;;  %903 = vmatpush3.msra.mxu1 %v750_v21  ;;  %v649_v13 = vmul.f32 %v1282_v35, %v1643_v34  ;;  %v677_v18 = vmul.f32 %v1288_v37, %v1642_v6  ;;  %v709_v59 = vmul.f32 %v1634_v10, %v1642_v6  ;;  %v1645_v35 = vld [vmem:[#allocation25_spill] sm:$0xff] }
 0x246   :  { %v529_v14 = vadd.f32 %v525_v27, %v517_v51  ;;  %904 = vmatprep.subr.mxu1 %v1633_v29  ;;  %v469_v33 = vadd.f32 %v465_v52, %v457_v60  ;;  %v641_v9 = vadd.f32 %v637_v8, %v629_v41  ;;  %v717_v57 = vmul.f32 %v1635_v43, %v1643_v34 }
 0x247   :  { %v589_v58 = vadd.f32 %v585_v7, %v577_v48  ;;  %v681_v24 = vadd.f32 %v677_v18, %v669_v15  ;;  %v689_v0 = vmul.f32 %v1644_v11, %v1643_v34  ;;  %v737_v43 = vmul.f32 %v1317_v54, %v1643_v34  ;;  %v758_v54 = vpop.permute.xlu1 %757 }
 0x248   :  { %v541_v20 = vadd.f32 %v537_v56, %v529_v14  ;;  %v473_v23 = vmul.f32 %v469_v33, %v1645_v35  ;;  %v653_v37 = vadd.f32 %v649_v13, %v641_v9  ;;  %v721_v32 = vadd.f32 %v717_v57, %v709_v59 }
 0x249   :  { %v601_v25 = vadd.f32 %v597_v50, %v589_v58  ;;  %v693_v10 = vadd.f32 %v689_v0, %v681_v24  ;;  %v741_v53 = vmul.f32 %v737_v43, %v1642_v6 }
 0x24a   :  { %v545_v49 = vmul.f32 %v541_v20, %v1636_v47  ;;  %v657_v12 = vmul.f32 %v653_v37, %v1639_v3  ;;  %v725_v4 = vmul.f32 %v721_v32, %v1641_v46  ;;  %v1646_v3 = vld [vmem:[#allocation26_spill] sm:$0xff] }
 0x24b   :  { %v605_v29 = vmul.f32 %v601_v25, %v1638_v55  ;;  %v697_v26 = vmul.f32 %v693_v10, %v1640_v19  ;;  %v753_v55 = vld [vmem:[%s1531_s4] sm:$0x1]  ;;  %v763_v34 = vrot.slane %v758_v54, %v1646_v3 }
 0x24c   :  { %v661_v31 = vadd.f32 %v657_v12, %v545_v49 }
 0x24d   :  { %v609_v45 = vadd.f32 %v605_v29, %v473_v23 }
 0x24e   :  { %v729_v22 = vadd.f32 %v725_v4, %v661_v31 }
 0x24f   :  { %v701_v36 = vadd.f32 %v697_v26, %v609_v45 }
 0x251   :  { %v745_v47 = vadd.f32 %v741_v53, %v701_v36 }
 0x253   :  { %v749_v52 = vadd.f32 %v745_v47, %v729_v22 }
 0x255   :  { %905 = vmatpush3.msra.mxu1 %v749_v52 }
 0x256   :  { %907 = vmatmul.mubr.msk.f32.vlgmr.msra.gmra.mxu1 %vm169_vm0, %v753_v55 }
 0x316   :  { %v833_v19 = vpop.f32.mrf.mxu1 }
 0x317   :  { %v834_v38 = vadd.f32 %v833_v19, %v763_v34 }
 0x318   :  { %v908_v46 = vpop.f32.mrf.mxu1 }
 0x319   :  { %837 = vst [vmem:[#allocation6] sm:$0x1] %v834_v38 }
 0x31a   :  { %959 = shalt.err (!%p956_p9)
}
 0x31b   :  { %847 = dma.vmem_to_hbm [thread:$0]  %s845_s20, 16, %s1533_s6, [#allocation5]  }
 0x31c   :  { %970 = dma.done.wait [#allocation5], 16  }
 0x31d   :  { %971 = vsyncadd [#allocation5], 4294967280 }
 0x31e   :  { %851 = vsyncpa [#allocation4], 1 }
 0x31f   :  { %852 = vsyncpa [#allocation5], 1 }

</bundles_post_ra>
